<compile_context>
chip_gen: v6e
topology: v6e:2x2x1
jax: 0.10.0
libtpu: 0.0.40
codegen_flags: <defaults>
</compile_context>

<pallas_src>
import math

import jax
import jax.numpy as jnp
import numpy as np
from jax.experimental import pallas as pl
from jax.experimental.pallas import tpu as pltpu


def _pick_tile(total, target, multiple):
    """Largest multiple of `multiple` that is <= min(target, total) and divides total."""
    t = min(target, total)
    t -= t % multiple
    t = max(t, multiple)
    while total % t != 0:
        t -= multiple
    return t


def _make_rbf_kernel(num_heads, num_kernels, enforce_periodicity, use_sin_recurrence):
    two_pi = 2.0 * math.pi

    def kernel(freqs_ref, wfold_ref, angle_ref, out_ref):
        # angle_ref: (tile_i, tile_j) VMEM block
        # freqs_ref: (1, K) SMEM; wfold_ref: (H, K) SMEM (pre-folded weights)
        # out_ref:   (H, tile_i, tile_j) VMEM block
        a = angle_ref[...]
        if enforce_periodicity:
            # Fold first, THEN zero fix-up -- matches the torch forward order.
            a = jnp.minimum(a, two_pi - a)
        a = jnp.where(a == 0.0, jnp.float32(1e-6), a)
        inv_a = 1.0 / a  # single exact reciprocal per element

        if use_sin_recurrence:
            # freqs are exactly 1..K: generate sin(k*a) from one sin + one cos
            # and accumulate into the H head tiles as we go (small live set).
            s_prev = jnp.sin(a)                       # sin(1*a)
            accs = [s_prev * wfold_ref[h, 0] for h in range(num_heads)]
            if num_kernels > 1:
                c2 = 2.0 * jnp.cos(a)
                s_curr = c2 * s_prev                  # sin(2a) = 2 cos(a) sin(a)
                for h in range(num_heads):
                    accs[h] = accs[h] + s_curr * wfold_ref[h, 1]
                for k in range(2, num_kernels):
                    s_next = c2 * s_curr - s_prev     # Chebyshev recurrence
                    s_prev, s_curr = s_curr, s_next
                    for h in range(num_heads):
                        accs[h] = accs[h] + s_curr * wfold_ref[h, k]
        else:
            # General (trainable / non-integer) frequencies: exact sin per k.
            accs = None
            for k in range(num_kernels):
                s = jnp.sin(a * freqs_ref[0, k])
                if accs is None:
                    accs = [s * wfold_ref[h, k] for h in range(num_heads)]
                else:
                    for h in range(num_heads):
                        accs[h] = accs[h] + s * wfold_ref[h, k]

        for h in range(num_heads):
            out_ref[h] = (accs[h] * inv_a).astype(out_ref.dtype)

    return kernel


def radial_bessel_basis(angle, freqs, weights, bias, *,
                        enforce_periodicity=False,
                        tile_i=None, tile_j=None,
                        out_dtype=jnp.float32,
                        use_sin_recurrence=None):
    """angle: (I, J) f32; freqs: (K,) f32; weights: (H, K) f32; bias: (H,) f32.
    Returns decay of shape (H, I, J) in `out_dtype` (f32 math throughout)."""
    I, J = angle.shape
    H, K = weights.shape
    assert I % 8 == 0 and J % 128 == 0, "I must be a multiple of 8, J of 128"

    # Block sizes: big enough to amortize per-step overhead, small enough to
    # stay well inside every generation's scoped-VMEM default (v5e 16 MiB) with
    # double buffering: footprint ~= 2*(1+H)*tile_i*tile_j*4 B + internal
    # scratch (~(H+4) tiles), about 9 MiB at the 256x512 target with H=4, f32.
    if tile_i is None:
        tile_i = _pick_tile(I, 256, 8)
    if tile_j is None:
        tile_j = _pick_tile(J, 512, 128)
    assert I % tile_i == 0 and J % tile_j == 0

    if use_sin_recurrence is None:
        # Auto-detect the default integer frequencies (arange(1, K+1)).
        try:
            fnp = np.asarray(freqs, dtype=np.float32)
            use_sin_recurrence = bool(
                np.array_equal(fnp, np.arange(1, K + 1, dtype=np.float32)))
        except Exception:  # traced freqs -> cannot inspect; use general path
            use_sin_recurrence = False

    angle = angle.astype(jnp.float32)
    freqs_f = jnp.asarray(freqs, jnp.float32)
    scale = np.float32(math.sqrt(2.0 / math.pi))
    # Fold sqrt(2/pi), 1/freq_k and bias_h into the weights (O(H*K) host work).
    wfold = (jnp.asarray(weights, jnp.float32) * scale
             * jnp.asarray(bias, jnp.float32)[:, None]
             / freqs_f[None, :])
    freqs2d = freqs_f.reshape(1, K)

    kernel = _make_rbf_kernel(H, K, enforce_periodicity, use_sin_recurrence)

    out_bytes = np.dtype(out_dtype).itemsize
    cost = pl.CostEstimate(
        flops=2 * H * K * I * J + 6 * I * J,
        transcendentals=(2 if use_sin_recurrence else K) * I * J,
        bytes_accessed=I * J * 4 + H * I * J * out_bytes)

    return pl.pallas_call(
        kernel,
        out_shape=jax.ShapeDtypeStruct((H, I, J), out_dtype),
        grid=(I // tile_i, J // tile_j),
        in_specs=[
            pl.BlockSpec(memory_space=pltpu.MemorySpace.SMEM),        # freqs (1, K)
            pl.BlockSpec(memory_space=pltpu.MemorySpace.SMEM),        # folded weights (H, K)
            pl.BlockSpec((tile_i, tile_j), lambda i, j: (i, j)),      # angle tile
        ],
        out_specs=pl.BlockSpec((H, tile_i, tile_j), lambda i, j: (0, i, j)),
        compiler_params=pltpu.CompilerParams(
            dimension_semantics=("parallel", "parallel")),
        cost_estimate=cost,
    )(freqs2d, wfold, angle)


def radial_bessel_basis_ref(angle, freqs, weights, bias,
                            enforce_periodicity=False):
    a = angle
    if enforce_periodicity:
        a = jnp.minimum(a, 2.0 * np.pi - a)
    a = jnp.where(a == 0.0, 1e-6, a)
    theta = jnp.einsum('ij,d->ijd', a, freqs)
    basis = jnp.sin(theta) / theta * np.sqrt(2.0 / np.pi)
    decay = jnp.einsum('ijc,hc->hij', basis, weights)
    return bias[:, None, None] * decay


if __name__ == "__main__":
    num_kernels = 8    # K
    num_heads = 4      # H
    I, J = 16, 128     # angle matrix ('i j')

    key = jax.random.PRNGKey(0)
    k_ang, k_w = jax.random.split(key)

    # Deterministic parameter init mirroring the torch __init__.
    freqs = jnp.arange(1, num_kernels + 1, dtype=jnp.float32)
    weights = (jax.random.normal(k_w, (num_heads, num_kernels), jnp.float32)
               / np.sqrt(num_kernels))
    bias = jnp.ones((num_heads,), jnp.float32) / num_heads

    angle = jax.random.uniform(k_ang, (I, J), jnp.float32,
                               minval=0.0, maxval=np.pi)
    # include exact zeros to exercise the angle==0 fix-up
    angle = angle.at[0, 0].set(0.0).at[3, 17].set(0.0)

    ref = radial_bessel_basis_ref(angle, freqs, weights, bias)

    # Default path: integer-frequency sin recurrence (1 sin + 1 cos per element).
    out = jax.block_until_ready(radial_bessel_basis(angle, freqs, weights, bias))
    assert out.shape == (num_heads, I, J)
    np.testing.assert_allclose(np.asarray(out), np.asarray(ref),
                               rtol=2e-5, atol=2e-5)

    # General path (trainable / non-integer freqs): direct sin per kernel.
    out2 = jax.block_until_ready(
        radial_bessel_basis(angle, freqs, weights, bias,
                            use_sin_recurrence=False))
    np.testing.assert_allclose(np.asarray(out2), np.asarray(ref),
                               rtol=1e-5, atol=1e-5)

    # Periodicity branch: fold to [0, pi] first, then zero fix-up (torch order).
    angle_p = jnp.concatenate([angle, 2.0 * np.pi - angle[:8]], axis=0)
    angle_p = angle_p.at[1, 1].set(2.0 * np.pi)   # folds to 0 -> replaced by 1e-6
    ref_p = radial_bessel_basis_ref(angle_p, freqs, weights, bias,
                                    enforce_periodicity=True)
    out_p = jax.block_until_ready(
        radial_bessel_basis(angle_p, freqs, weights, bias,
                            enforce_periodicity=True))
    np.testing.assert_allclose(np.asarray(out_p), np.asarray(ref_p),
                               rtol=2e-5, atol=2e-5)

    print("KERNEL_OK")
</pallas_src>

<mosaic_0001>
module attributes {stable_mosaic.version = 11 : i64} {
  func.func @kernel(%arg0: i32, %arg1: i32, %arg2: memref<1x8xf32, #tpu.memory_space<smem>>, %arg3: memref<4x8xf32, #tpu.memory_space<smem>>, %arg4: memref<16x128xf32, #tpu.memory_space<vmem>>, %arg5: memref<4x16x128xf32, #tpu.memory_space<vmem>>) attributes {dimension_semantics = [#tpu.dimension_semantics<parallel>, #tpu.dimension_semantics<parallel>], iteration_bounds = array<i64: 1, 1>, scalar_prefetch = 0 : i64, scratch_operands = 0 : i64, tpu.core_type = #tpu.core_type<tc>, window_params = [{transform_indices = @transform_0, window_bounds = array<i64: 1, 8>}, {transform_indices = @transform_1, window_bounds = array<i64: 4, 8>}, {transform_indices = @transform_2, window_bounds = array<i64: 16, 128>}, {transform_indices = @transform_3, window_bounds = array<i64: 4, 16, 128>}]} {
    %c0 = arith.constant 0 : index
    %c0_0 = arith.constant 0 : index
    %0 = vector.load %arg4[%c0, %c0_0] : memref<16x128xf32, #tpu.memory_space<vmem>>, vector<16x128xf32>
    %cst = arith.constant 0.000000e+00 : f32
    %1 = vector.broadcast %cst : f32 to vector<16x128xf32>
    %2 = arith.cmpf oeq, %0, %1 : vector<16x128xf32>
    %cst_1 = arith.constant 9.99999997E-7 : f32
    %3 = vector.broadcast %cst_1 : f32 to vector<16x128xf32>
    %4 = arith.select %2, %3, %0 : vector<16x128xi1>, vector<16x128xf32>
    %cst_2 = arith.constant 1.000000e+00 : f32
    %5 = vector.broadcast %cst_2 : f32 to vector<16x128xf32>
    %6 = arith.divf %5, %4 : vector<16x128xf32>
    %7 = math.sin %4 : vector<16x128xf32>
    %c0_3 = arith.constant 0 : index
    %c0_4 = arith.constant 0 : index
    %8 = memref.load %arg3[%c0_3, %c0_4] : memref<4x8xf32, #tpu.memory_space<smem>>
    %9 = vector.broadcast %8 : f32 to vector<16x128xf32>
    %10 = arith.mulf %7, %9 : vector<16x128xf32>
    %c1 = arith.constant 1 : index
    %c0_5 = arith.constant 0 : index
    %11 = memref.load %arg3[%c1, %c0_5] : memref<4x8xf32, #tpu.memory_space<smem>>
    %12 = vector.broadcast %11 : f32 to vector<16x128xf32>
    %13 = arith.mulf %7, %12 : vector<16x128xf32>
    %c2 = arith.constant 2 : index
    %c0_6 = arith.constant 0 : index
    %14 = memref.load %arg3[%c2, %c0_6] : memref<4x8xf32, #tpu.memory_space<smem>>
    %15 = vector.broadcast %14 : f32 to vector<16x128xf32>
    %16 = arith.mulf %7, %15 : vector<16x128xf32>
    %c3 = arith.constant 3 : index
    %c0_7 = arith.constant 0 : index
    %17 = memref.load %arg3[%c3, %c0_7] : memref<4x8xf32, #tpu.memory_space<smem>>
    %18 = vector.broadcast %17 : f32 to vector<16x128xf32>
    %19 = arith.mulf %7, %18 : vector<16x128xf32>
    %20 = math.cos %4 : vector<16x128xf32>
    %cst_8 = arith.constant 2.000000e+00 : f32
    %21 = vector.broadcast %cst_8 : f32 to vector<16x128xf32>
    %22 = arith.mulf %21, %20 : vector<16x128xf32>
    %23 = arith.mulf %22, %7 : vector<16x128xf32>
    %c0_9 = arith.constant 0 : index
    %c1_10 = arith.constant 1 : index
    %24 = memref.load %arg3[%c0_9, %c1_10] : memref<4x8xf32, #tpu.memory_space<smem>>
    %25 = vector.broadcast %24 : f32 to vector<16x128xf32>
    %26 = arith.mulf %23, %25 : vector<16x128xf32>
    %27 = arith.addf %10, %26 : vector<16x128xf32>
    %c1_11 = arith.constant 1 : index
    %c1_12 = arith.constant 1 : index
    %28 = memref.load %arg3[%c1_11, %c1_12] : memref<4x8xf32, #tpu.memory_space<smem>>
    %29 = vector.broadcast %28 : f32 to vector<16x128xf32>
    %30 = arith.mulf %23, %29 : vector<16x128xf32>
    %31 = arith.addf %13, %30 : vector<16x128xf32>
    %c2_13 = arith.constant 2 : index
    %c1_14 = arith.constant 1 : index
    %32 = memref.load %arg3[%c2_13, %c1_14] : memref<4x8xf32, #tpu.memory_space<smem>>
    %33 = vector.broadcast %32 : f32 to vector<16x128xf32>
    %34 = arith.mulf %23, %33 : vector<16x128xf32>
    %35 = arith.addf %16, %34 : vector<16x128xf32>
    %c3_15 = arith.constant 3 : index
    %c1_16 = arith.constant 1 : index
    %36 = memref.load %arg3[%c3_15, %c1_16] : memref<4x8xf32, #tpu.memory_space<smem>>
    %37 = vector.broadcast %36 : f32 to vector<16x128xf32>
    %38 = arith.mulf %23, %37 : vector<16x128xf32>
    %39 = arith.addf %19, %38 : vector<16x128xf32>
    %40 = arith.mulf %22, %23 : vector<16x128xf32>
    %41 = arith.subf %40, %7 : vector<16x128xf32>
    %c0_17 = arith.constant 0 : index
    %c2_18 = arith.constant 2 : index
    %42 = memref.load %arg3[%c0_17, %c2_18] : memref<4x8xf32, #tpu.memory_space<smem>>
    %43 = vector.broadcast %42 : f32 to vector<16x128xf32>
    %44 = arith.mulf %41, %43 : vector<16x128xf32>
    %45 = arith.addf %27, %44 : vector<16x128xf32>
    %c1_19 = arith.constant 1 : index
    %c2_20 = arith.constant 2 : index
    %46 = memref.load %arg3[%c1_19, %c2_20] : memref<4x8xf32, #tpu.memory_space<smem>>
    %47 = vector.broadcast %46 : f32 to vector<16x128xf32>
    %48 = arith.mulf %41, %47 : vector<16x128xf32>
    %49 = arith.addf %31, %48 : vector<16x128xf32>
    %c2_21 = arith.constant 2 : index
    %c2_22 = arith.constant 2 : index
    %50 = memref.load %arg3[%c2_21, %c2_22] : memref<4x8xf32, #tpu.memory_space<smem>>
    %51 = vector.broadcast %50 : f32 to vector<16x128xf32>
    %52 = arith.mulf %41, %51 : vector<16x128xf32>
    %53 = arith.addf %35, %52 : vector<16x128xf32>
    %c3_23 = arith.constant 3 : index
    %c2_24 = arith.constant 2 : index
    %54 = memref.load %arg3[%c3_23, %c2_24] : memref<4x8xf32, #tpu.memory_space<smem>>
    %55 = vector.broadcast %54 : f32 to vector<16x128xf32>
    %56 = arith.mulf %41, %55 : vector<16x128xf32>
    %57 = arith.addf %39, %56 : vector<16x128xf32>
    %58 = arith.mulf %22, %41 : vector<16x128xf32>
    %59 = arith.subf %58, %23 : vector<16x128xf32>
    %c0_25 = arith.constant 0 : index
    %c3_26 = arith.constant 3 : index
    %60 = memref.load %arg3[%c0_25, %c3_26] : memref<4x8xf32, #tpu.memory_space<smem>>
    %61 = vector.broadcast %60 : f32 to vector<16x128xf32>
    %62 = arith.mulf %59, %61 : vector<16x128xf32>
    %63 = arith.addf %45, %62 : vector<16x128xf32>
    %c1_27 = arith.constant 1 : index
    %c3_28 = arith.constant 3 : index
    %64 = memref.load %arg3[%c1_27, %c3_28] : memref<4x8xf32, #tpu.memory_space<smem>>
    %65 = vector.broadcast %64 : f32 to vector<16x128xf32>
    %66 = arith.mulf %59, %65 : vector<16x128xf32>
    %67 = arith.addf %49, %66 : vector<16x128xf32>
    %c2_29 = arith.constant 2 : index
    %c3_30 = arith.constant 3 : index
    %68 = memref.load %arg3[%c2_29, %c3_30] : memref<4x8xf32, #tpu.memory_space<smem>>
    %69 = vector.broadcast %68 : f32 to vector<16x128xf32>
    %70 = arith.mulf %59, %69 : vector<16x128xf32>
    %71 = arith.addf %53, %70 : vector<16x128xf32>
    %c3_31 = arith.constant 3 : index
    %c3_32 = arith.constant 3 : index
    %72 = memref.load %arg3[%c3_31, %c3_32] : memref<4x8xf32, #tpu.memory_space<smem>>
    %73 = vector.broadcast %72 : f32 to vector<16x128xf32>
    %74 = arith.mulf %59, %73 : vector<16x128xf32>
    %75 = arith.addf %57, %74 : vector<16x128xf32>
    %76 = arith.mulf %22, %59 : vector<16x128xf32>
    %77 = arith.subf %76, %41 : vector<16x128xf32>
    %c0_33 = arith.constant 0 : index
    %c4 = arith.constant 4 : index
    %78 = memref.load %arg3[%c0_33, %c4] : memref<4x8xf32, #tpu.memory_space<smem>>
    %79 = vector.broadcast %78 : f32 to vector<16x128xf32>
    %80 = arith.mulf %77, %79 : vector<16x128xf32>
    %81 = arith.addf %63, %80 : vector<16x128xf32>
    %c1_34 = arith.constant 1 : index
    %c4_35 = arith.constant 4 : index
    %82 = memref.load %arg3[%c1_34, %c4_35] : memref<4x8xf32, #tpu.memory_space<smem>>
    %83 = vector.broadcast %82 : f32 to vector<16x128xf32>
    %84 = arith.mulf %77, %83 : vector<16x128xf32>
    %85 = arith.addf %67, %84 : vector<16x128xf32>
    %c2_36 = arith.constant 2 : index
    %c4_37 = arith.constant 4 : index
    %86 = memref.load %arg3[%c2_36, %c4_37] : memref<4x8xf32, #tpu.memory_space<smem>>
    %87 = vector.broadcast %86 : f32 to vector<16x128xf32>
    %88 = arith.mulf %77, %87 : vector<16x128xf32>
    %89 = arith.addf %71, %88 : vector<16x128xf32>
    %c3_38 = arith.constant 3 : index
    %c4_39 = arith.constant 4 : index
    %90 = memref.load %arg3[%c3_38, %c4_39] : memref<4x8xf32, #tpu.memory_space<smem>>
    %91 = vector.broadcast %90 : f32 to vector<16x128xf32>
    %92 = arith.mulf %77, %91 : vector<16x128xf32>
    %93 = arith.addf %75, %92 : vector<16x128xf32>
    %94 = arith.mulf %22, %77 : vector<16x128xf32>
    %95 = arith.subf %94, %59 : vector<16x128xf32>
    %c0_40 = arith.constant 0 : index
    %c5 = arith.constant 5 : index
    %96 = memref.load %arg3[%c0_40, %c5] : memref<4x8xf32, #tpu.memory_space<smem>>
    %97 = vector.broadcast %96 : f32 to vector<16x128xf32>
    %98 = arith.mulf %95, %97 : vector<16x128xf32>
    %99 = arith.addf %81, %98 : vector<16x128xf32>
    %c1_41 = arith.constant 1 : index
    %c5_42 = arith.constant 5 : index
    %100 = memref.load %arg3[%c1_41, %c5_42] : memref<4x8xf32, #tpu.memory_space<smem>>
    %101 = vector.broadcast %100 : f32 to vector<16x128xf32>
    %102 = arith.mulf %95, %101 : vector<16x128xf32>
    %103 = arith.addf %85, %102 : vector<16x128xf32>
    %c2_43 = arith.constant 2 : index
    %c5_44 = arith.constant 5 : index
    %104 = memref.load %arg3[%c2_43, %c5_44] : memref<4x8xf32, #tpu.memory_space<smem>>
    %105 = vector.broadcast %104 : f32 to vector<16x128xf32>
    %106 = arith.mulf %95, %105 : vector<16x128xf32>
    %107 = arith.addf %89, %106 : vector<16x128xf32>
    %c3_45 = arith.constant 3 : index
    %c5_46 = arith.constant 5 : index
    %108 = memref.load %arg3[%c3_45, %c5_46] : memref<4x8xf32, #tpu.memory_space<smem>>
    %109 = vector.broadcast %108 : f32 to vector<16x128xf32>
    %110 = arith.mulf %95, %109 : vector<16x128xf32>
    %111 = arith.addf %93, %110 : vector<16x128xf32>
    %112 = arith.mulf %22, %95 : vector<16x128xf32>
    %113 = arith.subf %112, %77 : vector<16x128xf32>
    %c0_47 = arith.constant 0 : index
    %c6 = arith.constant 6 : index
    %114 = memref.load %arg3[%c0_47, %c6] : memref<4x8xf32, #tpu.memory_space<smem>>
    %115 = vector.broadcast %114 : f32 to vector<16x128xf32>
    %116 = arith.mulf %113, %115 : vector<16x128xf32>
    %117 = arith.addf %99, %116 : vector<16x128xf32>
    %c1_48 = arith.constant 1 : index
    %c6_49 = arith.constant 6 : index
    %118 = memref.load %arg3[%c1_48, %c6_49] : memref<4x8xf32, #tpu.memory_space<smem>>
    %119 = vector.broadcast %118 : f32 to vector<16x128xf32>
    %120 = arith.mulf %113, %119 : vector<16x128xf32>
    %121 = arith.addf %103, %120 : vector<16x128xf32>
    %c2_50 = arith.constant 2 : index
    %c6_51 = arith.constant 6 : index
    %122 = memref.load %arg3[%c2_50, %c6_51] : memref<4x8xf32, #tpu.memory_space<smem>>
    %123 = vector.broadcast %122 : f32 to vector<16x128xf32>
    %124 = arith.mulf %113, %123 : vector<16x128xf32>
    %125 = arith.addf %107, %124 : vector<16x128xf32>
    %c3_52 = arith.constant 3 : index
    %c6_53 = arith.constant 6 : index
    %126 = memref.load %arg3[%c3_52, %c6_53] : memref<4x8xf32, #tpu.memory_space<smem>>
    %127 = vector.broadcast %126 : f32 to vector<16x128xf32>
    %128 = arith.mulf %113, %127 : vector<16x128xf32>
    %129 = arith.addf %111, %128 : vector<16x128xf32>
    %130 = arith.mulf %22, %113 : vector<16x128xf32>
    %131 = arith.subf %130, %95 : vector<16x128xf32>
    %c0_54 = arith.constant 0 : index
    %c7 = arith.constant 7 : index
    %132 = memref.load %arg3[%c0_54, %c7] : memref<4x8xf32, #tpu.memory_space<smem>>
    %133 = vector.broadcast %132 : f32 to vector<16x128xf32>
    %134 = arith.mulf %131, %133 : vector<16x128xf32>
    %135 = arith.addf %117, %134 : vector<16x128xf32>
    %c1_55 = arith.constant 1 : index
    %c7_56 = arith.constant 7 : index
    %136 = memref.load %arg3[%c1_55, %c7_56] : memref<4x8xf32, #tpu.memory_space<smem>>
    %137 = vector.broadcast %136 : f32 to vector<16x128xf32>
    %138 = arith.mulf %131, %137 : vector<16x128xf32>
    %139 = arith.addf %121, %138 : vector<16x128xf32>
    %c2_57 = arith.constant 2 : index
    %c7_58 = arith.constant 7 : index
    %140 = memref.load %arg3[%c2_57, %c7_58] : memref<4x8xf32, #tpu.memory_space<smem>>
    %141 = vector.broadcast %140 : f32 to vector<16x128xf32>
    %142 = arith.mulf %131, %141 : vector<16x128xf32>
    %143 = arith.addf %125, %142 : vector<16x128xf32>
    %c3_59 = arith.constant 3 : index
    %c7_60 = arith.constant 7 : index
    %144 = memref.load %arg3[%c3_59, %c7_60] : memref<4x8xf32, #tpu.memory_space<smem>>
    %145 = vector.broadcast %144 : f32 to vector<16x128xf32>
    %146 = arith.mulf %131, %145 : vector<16x128xf32>
    %147 = arith.addf %129, %146 : vector<16x128xf32>
    %148 = arith.mulf %135, %6 : vector<16x128xf32>
    %c0_61 = arith.constant 0 : index
    %c0_62 = arith.constant 0 : index
    %c0_63 = arith.constant 0 : index
    %149 = vector.load %arg5[%c0_61, %c0_62, %c0_63] : memref<4x16x128xf32, #tpu.memory_space<vmem>>, vector<1x16x128xf32>
    %150 = vector.shape_cast %149 : vector<1x16x128xf32> to vector<16x128xf32>
    %151 = vector.shape_cast %148 : vector<16x128xf32> to vector<1x16x128xf32>
    tpu.vector_store %arg5[%c0_61, %c0_62, %c0_63], %151 {strides = array<i32>} : memref<4x16x128xf32, #tpu.memory_space<vmem>>, vector<1x16x128xf32>,
    %152 = arith.mulf %139, %6 : vector<16x128xf32>
    %c1_64 = arith.constant 1 : index
    %c0_65 = arith.constant 0 : index
    %c0_66 = arith.constant 0 : index
    %153 = vector.load %arg5[%c1_64, %c0_65, %c0_66] : memref<4x16x128xf32, #tpu.memory_space<vmem>>, vector<1x16x128xf32>
    %154 = vector.shape_cast %153 : vector<1x16x128xf32> to vector<16x128xf32>
    %155 = vector.shape_cast %152 : vector<16x128xf32> to vector<1x16x128xf32>
    tpu.vector_store %arg5[%c1_64, %c0_65, %c0_66], %155 {strides = array<i32>} : memref<4x16x128xf32, #tpu.memory_space<vmem>>, vector<1x16x128xf32>,
    %156 = arith.mulf %143, %6 : vector<16x128xf32>
    %c2_67 = arith.constant 2 : index
    %c0_68 = arith.constant 0 : index
    %c0_69 = arith.constant 0 : index
    %157 = vector.load %arg5[%c2_67, %c0_68, %c0_69] : memref<4x16x128xf32, #tpu.memory_space<vmem>>, vector<1x16x128xf32>
    %158 = vector.shape_cast %157 : vector<1x16x128xf32> to vector<16x128xf32>
    %159 = vector.shape_cast %156 : vector<16x128xf32> to vector<1x16x128xf32>
    tpu.vector_store %arg5[%c2_67, %c0_68, %c0_69], %159 {strides = array<i32>} : memref<4x16x128xf32, #tpu.memory_space<vmem>>, vector<1x16x128xf32>,
    %160 = arith.mulf %147, %6 : vector<16x128xf32>
    %c3_70 = arith.constant 3 : index
    %c0_71 = arith.constant 0 : index
    %c0_72 = arith.constant 0 : index
    %161 = vector.load %arg5[%c3_70, %c0_71, %c0_72] : memref<4x16x128xf32, #tpu.memory_space<vmem>>, vector<1x16x128xf32>
    %162 = vector.shape_cast %161 : vector<1x16x128xf32> to vector<16x128xf32>
    %163 = vector.shape_cast %160 : vector<16x128xf32> to vector<1x16x128xf32>
    tpu.vector_store %arg5[%c3_70, %c0_71, %c0_72], %163 {strides = array<i32>} : memref<4x16x128xf32, #tpu.memory_space<vmem>>, vector<1x16x128xf32>,
    return
  }
  func.func @transform_0(%arg0: i32, %arg1: i32) -> (i32, i32) {
    %c0_i32 = arith.constant 0 : i32
    %c0_i32_0 = arith.constant 0 : i32
    %c0_i32_1 = arith.constant 0 : i32
    return %c0_i32, %c0_i32_0 : i32, i32
  }
  func.func @transform_1(%arg0: i32, %arg1: i32) -> (i32, i32) {
    %c0_i32 = arith.constant 0 : i32
    %c0_i32_0 = arith.constant 0 : i32
    %c0_i32_1 = arith.constant 0 : i32
    return %c0_i32, %c0_i32_0 : i32, i32
  }
  func.func @transform_2(%arg0: i32, %arg1: i32) -> (i32, i32) {
    %c0_i32 = arith.constant 0 : i32
    return %arg0, %arg1 : i32, i32
  }
  func.func @transform_3(%arg0: i32, %arg1: i32) -> (i32, i32, i32) {
    %c0_i32 = arith.constant 0 : i32
    %c0_i32_0 = arith.constant 0 : i32
    return %c0_i32, %arg0, %arg1 : i32, i32, i32
  }
}

</mosaic_0001>

<bundles_post_ra>
// kernel: tpu_custom_call.1
= control target key start
LH: loop header
LB: loop body
LE: loop exit
PB: predicated region body
PF: predicated region fallthrough
CT: control target
= control target key end

     0   :  { %s1338_s0 = inlined_call_operand.hbm [shape: f32[1,8], index: 0, kind: input, shape index: {}]   ;;  %s1339_s1 = inlined_call_operand.hbm [shape: f32[4,8], index: 1, kind: input, shape index: {}]   ;;  %s1340_s2 = inlined_call_operand.hbm [shape: f32[16,128], index: 2, kind: input, shape index: {}]   ;;  %s1341_s3 = inlined_call_operand.hbm [shape: f32[4,16,128], index: 3, kind: output, shape index: {}]  }
   0x1   :  { %1344 = sst [smem:[#allocation14_spill]] %s1341_s3 }
   0x2   :  { %8 = vsyncpa [#allocation5], 0 }
   0x3   :  { %9 = vsyncpa [#allocation7], 0 }
   0x4   :  { %10 = vsyncpa [#allocation3], 0 }
   0x5   :  { %11 = vsyncpa [#allocation4], 0  ;;  %s867_s12 = smov [#allocation2]   ;;  %s868_s15 = smov [#allocation6]  }
   0x6   :  { %19 = dma.hbm_to_smem %s1338_s0, 16, %s867_s12, [#allocation5]  }
   0x7   :  { %27 = dma.hbm_to_smem %s1339_s1, 64, %s868_s15, [#allocation7]  }
   0x8   :  { %s869_s18 = smov [#allocation8]  }
   0x9   :  { %s33_s19 = sshll.u32 %s869_s18, 4  ;;  %s34_s19 = int_to_ptr.vmem [resolvable:$true] %s33_s19 }
   0xa   :  { %s827_s20 = scalar_lea.vmem %s34_s19, 256  ;;  %p832_p1 = scmp.lt.s32.totalorder %s34_s19, %s34_s19 }
   0xb   :  { %p828_p0 = scmp.ne.s32.totalorder %s34_s19, %s827_s20  ;;  %p833_p2 = scmp.lt.s32.totalorder %s827_s20, %s827_s20 }
   0xd   :  { %p834_p3 = por %p833_p2, %p832_p1 }
   0xf   :  { %p835_p4 = pnand %p834_p3, %p828_p0 }
  0x11   :  { %838 = shalt.err (!%p835_p4)
}
  0x12   :  { %s1342_s21 = smov 128   ;;  %s1343_s22 = smov 8  }
  0x13   :  { %39 = dma.hbm_to_vmem [thread:$0]  %s1340_s2, 256, %s34_s19, [#allocation3], %s1342_s21, %s1342_s21, %s1343_s22  }
  0x14   :  { %859 = dma.done.wait [#allocation5], 16  }
  0x15   :  { %860 = vsyncadd [#allocation5], 4294967280 }
  0x16   :  { %861 = dma.done.wait [#allocation7], 64  }
  0x17   :  { %862 = vsyncadd [#allocation7], 4294967232 }
  0x18   :  { %863 = dma.done.wait [#allocation3], 256  }
  0x19   :  { %864 = vsyncadd [#allocation3], 4294967040 }
  0x1a   :  { %49 = sfence }
  0x1b   :  { %v50_v0 = vld [vmem:[#allocation8] sm:$0xff]  ;;  %v51_v1 = vld [vmem:[#allocation8 + $0x8] sm:$0xff]  ;;  %v872_v21 = vmov 683565275   ;;  %v873_v23 = vmov 2475754826  }
  0x1c   :  { %vm52_vm0 = vcmp.eq.f32.partialorder %v50_v0, 0.0  ;;  %vm53_vm1 = vcmp.eq.f32.partialorder %v51_v1, 0.0  ;;  %v874_v25 = vmov 2131351028   ;;  %v875_v27 = vmov 2102212464  }
  0x1d   :  { %v911_v2 = vsel %vm52_vm0, 1e-06, %v50_v0  ;;  %v915_v5 = vsel %vm53_vm1, 1e-06, %v51_v1  ;;  %v876_v29 = vmov 920167782  }
  0x1e   :  { %v63_v3 = vand.u32 2139095040, %v911_v2  ;;  %v60_v4 = vand.u32 2147483647, %v911_v2  ;;  %v167_v7 = vand.u32 2139095040, %v915_v5  ;;  %v164_v10 = vand.u32 2147483647, %v915_v5 }
  0x1f   :  { %v877_v38 = vmov 1326507024   ;;  %s963_s1 = sld [smem:[#allocation6]]  ;;  %vm62_vm0 = vcmp.lt.s32.totalorder %v911_v2, 0 }
  0x20   :  { %v64_v6 = vshrl.u32 %v63_v3, 23  ;;  %v67_v9 = vand.u32 8388607, %v60_v4  ;;  %v168_v11 = vshrl.u32 %v167_v7, 23  ;;  %v171_v16 = vand.u32 8388607, %v164_v10 }
  0x21   :  { %s965_s2 = sld [smem:[#allocation6 + $0x1]]  ;;  %vm994_vm1 = vcmp.le.f32.partialorder %v60_v4, 0.7853982 }
  0x22   :  { %v724_v8 = vadd.s32 4294967169, %v64_v6  ;;  %v728_v13 = vadd.s32 4294967169, %v168_v11  ;;  %v68_v14 = vor.u32 8388608, %v67_v9  ;;  %v172_v32 = vor.u32 8388608, %v171_v16  ;;  %s967_s24 = sld [smem:[#allocation6 + $0x2]] }
  0x23   :  { %s969_s25 = sld [smem:[#allocation6 + $0x3]] }
  0x24   :  { %v70_v12 = vadd.s32 1, %v724_v8  ;;  %v174_v19 = vadd.s32 1, %v728_v13  ;;  %v923_v31 = vshll.u32 %v68_v14, 8  ;;  %v212_v56 = vshll.u32 %v172_v32, 8  ;;  %s971_s26 = sld [smem:[#allocation6 + $0x4]] }
  0x25   :  { %s973_s27 = sld [smem:[#allocation6 + $0x5]] }
  0x26   :  { %vm71_vm2 = vcmp.gt.s32.totalorder %v70_v12, 0  ;;  %vm175_vm4 = vcmp.gt.s32.totalorder %v174_v19, 0  ;;  %s975_s28 = sld [smem:[#allocation6 + $0x6]] }
  0x27   :  { %v72_v15 = vsel %vm71_vm2, %v70_v12, 0  ;;  %v176_v52 = vsel %vm175_vm4, %v174_v19, 0  ;;  %s977_s29 = sld [smem:[#allocation6 + $0x7]]  ;;  %vm1034_vm2 = vcmp.le.f32.partialorder %v164_v10, 0.7853982  ;;  %vm152_vm4 = vweird.f32 %v911_v2 }
  0x28   :  { %v74_v17 = vand.u32 31, %v72_v15  ;;  %v73_v18 = vshrl.u32 %v72_v15, 5  ;;  %v177_v55 = vshrl.u32 %v176_v52, 5  ;;  %v178_v60 = vand.u32 31, %v176_v52  ;;  %s979_s30 = sld [smem:[#allocation6 + $0x80]] }
  0x29   :  { %s981_s4 = sld [smem:[#allocation6 + $0x81]] }
  0x2a   :  { %v75_v20 = vsub.s32 32, %v74_v17  ;;  %v77_v22 = vshll.u32 %v872_v21, %v74_v17  ;;  %v80_v24 = vshll.u32 %v873_v23, %v74_v17  ;;  %v83_v26 = vshll.u32 %v874_v25, %v74_v17  ;;  %s984_s5 = sld [smem:[#allocation6 + $0x82]] }
  0x2b   :  { %v86_v28 = vshll.u32 %v875_v27, %v74_v17  ;;  %v89_v30 = vshll.u32 %v876_v29, %v74_v17  ;;  %vm92_vm3 = vcmp.lt.s32.totalorder %v73_v18, 1  ;;  %vm95_vm5 = vcmp.lt.s32.totalorder %v73_v18, 4  ;;  %s987_s6 = sld [smem:[#allocation6 + $0x83]] }
  0x2c   :  { %v76_v33 = vshrl.u32 %v872_v21, %v75_v20  ;;  %v78_v34 = vshrl.u32 %v873_v23, %v75_v20  ;;  %v81_v35 = vshrl.u32 %v874_v25, %v75_v20  ;;  %v84_v36 = vshrl.u32 %v875_v27, %v75_v20  ;;  %s990_s7 = sld [smem:[#allocation6 + $0x84]] }
  0x2d   :  { %v87_v37 = vshrl.u32 %v876_v29, %v75_v20  ;;  %v90_v39 = vshrl.u32 %v877_v38, %v75_v20  ;;  %vm93_vm6 = vcmp.lt.s32.totalorder %v73_v18, 2  ;;  %vm94_vm7 = vcmp.lt.s32.totalorder %v73_v18, 3  ;;  %s998_s8 = sld [smem:[#allocation6 + $0x85]] }
  0x2e   :  { %v79_v40 = vor.u32 %v78_v34, %v77_v22  ;;  %v82_v41 = vor.u32 %v81_v35, %v80_v24  ;;  %v85_v42 = vor.u32 %v84_v36, %v83_v26  ;;  %v179_v1 = vsub.s32 32, %v178_v60  ;;  %s1000_s9 = sld [smem:[#allocation6 + $0x86]] }
  0x2f   :  { %v88_v43 = vor.u32 %v87_v37, %v86_v28  ;;  %v91_v44 = vor.u32 %v90_v39, %v89_v30  ;;  %v181_v3 = vshll.u32 %v872_v21, %v178_v60  ;;  %v184_v6 = vshll.u32 %v873_v23, %v178_v60  ;;  %s1004_s10 = sld [smem:[#allocation6 + $0x87]] }
  0x30   :  { %v96_v45 = vsel %vm92_vm3, %v76_v33, %v79_v40  ;;  %v97_v46 = vsel %vm95_vm5, %v85_v42, 2102212464  ;;  %v100_v47 = vsel %vm92_vm3, %v79_v40, %v82_v41  ;;  %v104_v48 = vsel %vm92_vm3, %v82_v41, %v85_v42  ;;  %s1012_s11 = sld [smem:[#allocation6 + $0x100]] }
  0x31   :  { %v98_v49 = vsel %vm94_vm7, %v82_v41, %v97_v46  ;;  %v101_v50 = vsel %vm95_vm5, %v88_v43, 920167782  ;;  %v105_v51 = vsel %vm95_vm5, %v91_v44, 1326507024  ;;  %v187_v7 = vshll.u32 %v874_v25, %v178_v60  ;;  %s1014_s12 = sld [smem:[#allocation6 + $0x101]] }
  0x32   :  { %v102_v53 = vsel %vm94_vm7, %v85_v42, %v101_v50  ;;  %v106_v54 = vsel %vm94_vm7, %v88_v43, %v105_v51  ;;  %v99_v57 = vsel %vm93_vm6, %v96_v45, %v98_v49  ;;  %v190_v9 = vshll.u32 %v875_v27, %v178_v60  ;;  %s1016_s13 = sld [smem:[#allocation6 + $0x102]] }
  0x33   :  { %v103_v58 = vsel %vm93_vm6, %v100_v47, %v102_v53  ;;  %v107_v59 = vsel %vm93_vm6, %v104_v48, %v106_v54  ;;  %v115_v8 = vmul.u32 %v923_v31, %v99_v57  ;;  %v193_v11 = vshll.u32 %v876_v29, %v178_v60  ;;  %s1020_s14 = sld [smem:[#allocation6 + $0x103]] }
  0x34   :  { %v930_v61 = vmul.u32.u64.low %v923_v31, %v107_v59  ;;  %v931_v62 = vmul.u32.u64.high %v923_v31, %v107_v59, %v930_v61  ;;  %v934_v63 = vmul.u32.u64.low %v923_v31, %v103_v58  ;;  %v935_v0 = vmul.u32.u64.high %v923_v31, %v103_v58, %v934_v63  ;;  %s1022_s15 = sld [smem:[#allocation6 + $0x104]] }
  0x35   :  { %vm196_vm8 = vcmp.lt.s32.totalorder %v177_v55, 1  ;;  %v180_v12 = vshrl.u32 %v872_v21, %v179_v1  ;;  %v182_v13 = vshrl.u32 %v873_v23, %v179_v1  ;;  %v185_v14 = vshrl.u32 %v874_v25, %v179_v1  ;;  %s1024_s16 = sld [smem:[#allocation6 + $0x105]] }
  0x36   :  { %v188_v15 = vshrl.u32 %v875_v27, %v179_v1  ;;  %vm117_vm9 = vc.u32 %v931_v62, %v934_v63  ;;  %v118_v16 = vadd.s32 1, %v935_v0  ;;  %v191_v17 = vshrl.u32 %v876_v29, %v179_v1  ;;  %s1028_s17 = sld [smem:[#allocation6 + $0x106]] }
  0x37   :  { %vm197_vm10 = vcmp.lt.s32.totalorder %v177_v55, 2  ;;  %v183_v18 = vor.u32 %v182_v13, %v181_v3  ;;  %v186_v19 = vor.u32 %v185_v14, %v184_v6  ;;  %v194_v22 = vshrl.u32 %v877_v38, %v179_v1  ;;  %s1039_s18 = sld [smem:[#allocation6 + $0x107]] }
  0x38   :  { %v189_v20 = vor.u32 %v188_v15, %v187_v7  ;;  %v119_v24 = vsel %vm117_vm9, %v118_v16, %v935_v0  ;;  %v192_v26 = vor.u32 %v191_v17, %v190_v9  ;;  %vm198_vm11 = vcmp.lt.s32.totalorder %v177_v55, 3  ;;  %s1044_s19 = sld [smem:[#allocation6 + $0x180]] }
  0x39   :  { %vm199_vm12 = vcmp.lt.s32.totalorder %v177_v55, 4  ;;  %v120_v28 = vadd.s32 %v119_v24, %v115_v8  ;;  %v195_v21 = vor.u32 %v194_v22, %v193_v11  ;;  %v200_v23 = vsel %vm196_vm8, %v180_v12, %v183_v18  ;;  %s1051_s20 = sld [smem:[#allocation6 + $0x181]] }
  0x3a   :  { %v201_v25 = vsel %vm199_vm12, %v189_v20, 2102212464  ;;  %v204_v30 = vsel %vm196_vm8, %v183_v18, %v186_v19  ;;  %v205_v31 = vsel %vm199_vm12, %v192_v26, 920167782  ;;  %v208_v29 = vsel %vm196_vm8, %v186_v19, %v189_v20  ;;  %s1058_s0 = sld [smem:[#allocation6 + $0x182]] }
  0x3b   :  { %v202_v27 = vsel %vm198_vm11, %v186_v19, %v201_v25  ;;  %v121_v32 = vadd.s32 536870912, %v120_v28  ;;  %v206_v33 = vsel %vm198_vm11, %v189_v20, %v205_v31  ;;  %v209_v34 = vsel %vm199_vm12, %v195_v21, 1326507024  ;;  %s1066_s23 = sld [smem:[#allocation6 + $0x183]] }
  0x3c   :  { %v203_v35 = vsel %vm197_vm10, %v200_v23, %v202_v27  ;;  %v207_v36 = vsel %vm197_vm10, %v204_v30, %v206_v33  ;;  %v210_v37 = vsel %vm198_vm11, %v192_v26, %v209_v34  ;;  %v116_v58 = vadd.s32 %v934_v63, %v931_v62  ;;  %s1071_s21 = sld [smem:[#allocation6 + $0x184]] }
  0x3d   :  { %v946_v38 = vshrl.u32 %v121_v32, 30  ;;  %v211_v39 = vsel %vm197_vm10, %v208_v29, %v210_v37  ;;  %v949_v40 = vmul.u32.u64.low %v212_v56, %v207_v36  ;;  %v950_v41 = vmul.u32.u64.high %v212_v56, %v207_v36, %v949_v40  ;;  %s1077_s22 = sld [smem:[#allocation6 + $0x185]] }
  0x3e   :  { %v952_v42 = vmul.u32.u64.low %v212_v56, %v211_v39  ;;  %v953_v43 = vmul.u32.u64.high %v212_v56, %v211_v39, %v952_v42  ;;  %v219_v45 = vmul.u32 %v212_v56, %v203_v35  ;;  %v269_v36 = vstv %s963_s1  ;;  %s1081_s3 = sld [smem:[#allocation6 + $0x186]] }
  0x3f   :  { %v123_v44 = vshll.u32 %v946_v38, 30  ;;  %v222_v47 = vadd.s32 1, %v950_v41  ;;  %v146_v17 = vsub.s32 4, %v946_v38  ;;  %vm166_vm3 = vcmp.lt.s32.totalorder %v915_v5, 0  ;;  %s1252_s1 = sld [smem:[#allocation6 + $0x187]] }
  0x40   :  { %vm221_vm13 = vc.u32 %v953_v43, %v949_v40  ;;  %v220_v14 = vadd.s32 %v949_v40, %v953_v43  ;;  %v523_v39 = vstv %s967_s24  ;;  %v551_v40 = vstv %s969_s25 }
  0x41   :  { %v124_v46 = vsub.s32 %v120_v28, %v123_v44  ;;  %v223_v49 = vsel %vm221_vm13, %v222_v47, %v950_v41  ;;  %v147_v23 = vsel %vm62_vm0, %v146_v17, %v946_v38  ;;  %v495_v38 = vstv %s965_s2 }
  0x42   :  { %v224_v50 = vadd.s32 %v223_v49, %v219_v45  ;;  %v149_v29 = vsel %vm994_vm1, 0, %v147_v23  ;;  %v579_v42 = vstv %s971_s26  ;;  %v607_v10 = vstv %s973_s27 }
  0x43   :  { %v126_v48 = vsub.s32 0, %v124_v46  ;;  %v153_v33 = vadd.s32 3, %v149_v29  ;;  %v635_v43 = vstv %s975_s28  ;;  %v663_v44 = vstv %s977_s29 }
  0x44   :  { %v225_v52 = vadd.s32 536870912, %v224_v50  ;;  %vm256_vm11 = vweird.f32 %v915_v5  ;;  %v513_v23 = vstv %s1051_s20 }
  0x45   :  { %v725_v51 = vmin.u32 %v126_v48, %v124_v46  ;;  %v154_v45 = vand.u32 3, %v153_v33 }
  0x46   :  { %v959_v54 = vshrl.u32 %v225_v52, 30  ;;  %v529_v52 = vstv %s984_s5 }
  0x47   :  { %v128_v53 = vclz %v725_v51  ;;  %v501_v51 = vstv %s981_s4  ;;  %vm159_vm5 = vcmp.eq.s32.totalorder %v154_v45, 2  ;;  %vm156_vm7 = vcmp.eq.s32.totalorder %v154_v45, 0 }
  0x48   :  { %v227_v57 = vshll.u32 %v959_v54, 30  ;;  %v250_v35 = vsub.s32 4, %v959_v54  ;;  %vm155_vm9 = vcmp.lt.s32.totalorder %v154_v45, 2 }
  0x49   :  { %v726_v55 = vadd.s32 4294967294, %v128_v53  ;;  %v557_v53 = vstv %s987_s6 }
  0x4a   :  { %v228_v59 = vsub.s32 %v224_v50, %v227_v57  ;;  %v251_v48 = vsel %vm166_vm3, %v250_v35, %v959_v54  ;;  %v273_v50 = vstv %s979_s30  ;;  %v613_v57 = vstv %s998_s8 }
  0x4b   :  { %vm727_vm14 = vcmp.lt.s32.totalorder %v726_v55, 0  ;;  %v253_v54 = vsel %vm1034_vm2, 0, %v251_v48 }
  0x4c   :  { %v131_v56 = vsel %vm727_vm14, 0, %v726_v55  ;;  %v230_v1 = vsub.s32 0, %v228_v59  ;;  %v585_v55 = vstv %s990_s7 }
  0x4d   :  { %v132_v60 = vsub.s32 32, %v131_v56  ;;  %v133_v61 = vshll.u32 %v124_v46, %v131_v56  ;;  %v136_v0 = vsub.s32 4294967266, %v131_v56  ;;  %v377_v46 = vand.u32 3, %v149_v29 }
  0x4e   :  { %v729_v62 = vmin.u32 %v230_v1, %v228_v59  ;;  %v669_v56 = vstv %s1004_s10 }
  0x4f   :  { %v134_v3 = vshrl.u32 %v116_v58, %v132_v60  ;;  %v137_v6 = vadd.s32 127, %v136_v0  ;;  %v641_v58 = vstv %s1000_s9  ;;  %vm382_vm6 = vcmp.eq.s32.totalorder %v377_v46, 2 }
  0x50   :  { %v232_v8 = vclz %v729_v62  ;;  %v277_v60 = vstv %s1012_s11  ;;  %vm379_vm8 = vcmp.eq.s32.totalorder %v377_v46, 0  ;;  %vm378_vm10 = vcmp.lt.s32.totalorder %v377_v46, 2 }
  0x51   :  { %v135_v63 = vor.u32 %v134_v3, %v133_v61  ;;  %v138_v7 = vshll.u32 %v137_v6, 23  ;;  %v507_v61 = vstv %s1014_s12  ;;  %v535_v3 = vstv %s1016_s13 }
  0x52   :  { %v730_v12 = vadd.s32 4294967294, %v232_v8  ;;  %v257_v62 = vadd.s32 3, %v253_v54  ;;  %v563_v8 = vstv %s1020_s14 }
  0x53   :  { %v139_v9 = vor.u32 4788187, %v138_v7  ;;  %v142_v11 = vcvt.s32.f32 %v135_v63 }
  0x54   :  { %vm731_vm15 = vcmp.lt.s32.totalorder %v730_v12, 0 }
  0x55   :  { %v140_v13 = vand.u32 2147483647, %v139_v9  ;;  %v235_v16 = vsel %vm731_vm15, 0, %v730_v12  ;;  %v591_v9 = vstv %s1022_s15 }
  0x56   :  { %v236_v18 = vsub.s32 32, %v235_v16  ;;  %v237_v19 = vshll.u32 %v228_v59, %v235_v16  ;;  %v240_v20 = vsub.s32 4294967266, %v235_v16 }
  0x57   :  { %v143_v15 = vmul.f32 %v142_v11, %v140_v13  ;;  %v480_v13 = vand.u32 3, %v253_v54 }
  0x58   :  { %v238_v26 = vshrl.u32 %v220_v14, %v236_v18  ;;  %v241_v28 = vadd.s32 127, %v240_v20  ;;  %v619_v14 = vstv %s1024_s16  ;;  %v647_v18 = vstv %s1028_s17 }
  0x59   :  { %v144_v24 = vxor.u32 2147483648, %v143_v15  ;;  %vm481_vm12 = vcmp.lt.s32.totalorder %v480_v13, 2  ;;  %vm482_vm13 = vcmp.eq.s32.totalorder %v480_v13, 0  ;;  %vm485_vm15 = vcmp.eq.s32.totalorder %v480_v13, 2 }
  0x5a   :  { %v239_v25 = vor.u32 %v238_v26, %v237_v19  ;;  %v242_v27 = vshll.u32 %v241_v28, 23  ;;  %v675_v19 = vstv %s1039_s18  ;;  %v258_v26 = vand.u32 3, %v257_v62 }
  0x5b   :  { %v145_v21 = vsel %vm62_vm0, %v144_v24, %v143_v15  ;;  %v281_v28 = vstv %s1044_s19 }
  0x5c   :  { %v148_v4 = vsel %vm994_vm1, %v911_v2, %v145_v21  ;;  %v243_v30 = vor.u32 4788187, %v242_v27  ;;  %v246_v31 = vcvt.s32.f32 %v239_v25  ;;  %v569_v25 = vstv %s1066_s23 }
  0x5d   :  { %791 = vcosq.f32 %v148_v4  ;;  %v597_v27 = vstv %s1071_s21  ;;  %vm263_vm14 = vcmp.eq.s32.totalorder %v258_v26, 2  ;;  %vm259_vm0 = vcmp.lt.s32.totalorder %v258_v26, 2  ;;  %s878_s21 = smov [#allocation9]  }
  0x5e   :  { %793 = vsinq.f32 %v148_v4  ;;  %v244_v32 = vand.u32 2147483647, %v243_v30  ;;  %v541_v4 = vstv %s1058_s0  ;;  %v625_v30 = vstv %s1077_s22  ;;  %s710_s22 = sshll.u32 %s878_s21, 4  ;;  %s711_s22 = int_to_ptr.vmem [resolvable:$true] %s710_s22 }
  0x5f   :  { %795 = vrcp.f32 %v911_v2  ;;  %v653_v2 = vstv %s1081_s3  ;;  %vm260_vm1 = vcmp.eq.s32.totalorder %v258_v26, 0  ;;  %s839_s2 = scalar_lea.vmem %s711_s22, 1024  ;;  %p844_p6 = scmp.lt.s32.totalorder %s711_s22, %s711_s22 }
  0x60   :  { %v247_v34 = vmul.f32 %v246_v31, %v244_v32  ;;  %797 = vrcp.f32 %v915_v5  ;;  %p840_p5 = scmp.ne.s32.totalorder %s711_s22, %s839_s2  ;;  %p845_p7 = scmp.lt.s32.totalorder %s839_s2, %s839_s2 }
  0x62   :  { %v248_v41 = vxor.u32 2147483648, %v247_v34  ;;  %p846_p8 = por %p845_p7, %p844_p6 }
  0x64   :  { %v249_v47 = vsel %vm166_vm3, %v248_v41, %v247_v34  ;;  %p847_p9 = pnand %p846_p8, %p840_p5 }
  0x65   :  { %v252_v49 = vsel %vm1034_vm2, %v915_v5, %v249_v47 }
  0x66   :  { %799 = vcosq.f32 %v252_v49 }
  0x67   :  { %801 = vsinq.f32 %v252_v49 }
  0x6a   :  { %v792_v59 = vpop.eup %791 }
  0x6b   :  { %v794_v0 = vpop.eup %793  ;;  %v160_v1 = vxor.u32 2147483648, %v792_v59 }
  0x6c   :  { %v157_v6 = vxor.u32 2147483648, %v794_v0  ;;  %v1087_v15 = vpop.eup %795 }
  0x6d   :  { %v161_v63 = vsel %vm159_vm5, %v160_v1, %v794_v0  ;;  %v384_v7 = vsel %vm382_vm6, %v160_v1, %v794_v0  ;;  %v1091_v20 = vpop.eup %797 }
  0x6e   :  { %v158_v11 = vsel %vm156_vm7, %v792_v59, %v157_v6  ;;  %v381_v12 = vsel %vm379_vm8, %v792_v59, %v157_v6 }
  0x6f   :  { %v162_v16 = vsel %vm155_vm9, %v158_v11, %v161_v63  ;;  %v385_v17 = vsel %vm378_vm10, %v381_v12, %v384_v7 }
  0x70   :  { %v163_v22 = vsel %vm152_vm4, nan, %v162_v16  ;;  %v386_v24 = vsel %vm152_vm4, nan, %v385_v17 }
  0x71   :  { %v1099_v21 = vmul.f32 2.0, %v386_v24  ;;  %v270_v31 = vmul.f32 %v269_v36, %v163_v22  ;;  %v274_v32 = vmul.f32 %v273_v50, %v163_v22  ;;  %v278_v33 = vmul.f32 %v277_v60, %v163_v22 }
  0x72   :  { %v282_v34 = vmul.f32 %v281_v28, %v163_v22 }
  0x73   :  { %v492_v29 = vmul.f32 %v1099_v21, %v163_v22  ;;  %v800_v35 = vpop.eup %799 }
  0x74   :  { %v802_v47 = vpop.eup %801  ;;  %v264_v48 = vxor.u32 2147483648, %v800_v35 }
  0x75   :  { %v496_v37 = vmul.f32 %v495_v38, %v492_v29  ;;  %v518_v41 = vmul.f32 %v492_v29, %v1099_v21  ;;  %v502_v45 = vmul.f32 %v501_v51, %v492_v29  ;;  %v508_v46 = vmul.f32 %v507_v61, %v492_v29 }
  0x76   :  { %v514_v49 = vmul.f32 %v513_v23, %v492_v29  ;;  %v261_v0 = vxor.u32 2147483648, %v802_v47  ;;  %v265_v6 = vsel %vm263_vm14, %v264_v48, %v802_v47  ;;  %v487_v62 = vsel %vm485_vm15, %v264_v48, %v802_v47 }
  0x77   :  { %v498_v54 = vadd.f32 %v496_v37, %v270_v31  ;;  %v520_v59 = vsub.f32 %v518_v41, %v163_v22  ;;  %v504_v1 = vadd.f32 %v502_v45, %v274_v32  ;;  %v510_v63 = vadd.f32 %v508_v46, %v278_v33 }
  0x78   :  { %v1127_v7 = vadd.f32 %v514_v49, %v282_v34  ;;  %v262_v16 = vsel %vm260_vm1, %v800_v35, %v261_v0  ;;  %v484_v17 = vsel %vm482_vm13, %v800_v35, %v261_v0 }
  0x79   :  { %v524_v11 = vmul.f32 %v523_v39, %v520_v59  ;;  %v546_v12 = vmul.f32 %v520_v59, %v1099_v21  ;;  %v266_v22 = vsel %vm259_vm0, %v262_v16, %v265_v6  ;;  %v488_v24 = vsel %vm481_vm12, %v484_v17, %v487_v62 }
  0x7a   :  { %v530_v31 = vmul.f32 %v529_v52, %v520_v59  ;;  %v536_v32 = vmul.f32 %v535_v3, %v520_v59  ;;  %v1141_v37 = vsel %vm256_vm11, nan, %v266_v22  ;;  %v489_v35 = vsel %vm256_vm11, nan, %v488_v24 }
  0x7b   :  { %v526_v33 = vadd.f32 %v524_v11, %v498_v54  ;;  %v548_v34 = vsub.f32 %v546_v12, %v492_v29  ;;  %v271_v13 = vmul.f32 %v269_v36, %v1141_v37  ;;  %v1148_v26 = vmul.f32 2.0, %v489_v35 }
  0x7c   :  { %v532_v41 = vadd.f32 %v530_v31, %v504_v1  ;;  %v275_v45 = vmul.f32 %v273_v50, %v1141_v37  ;;  %v538_v47 = vadd.f32 %v536_v32, %v510_v63  ;;  %v279_v49 = vmul.f32 %v277_v60, %v1141_v37 }
  0x7d   :  { %v552_v29 = vmul.f32 %v551_v40, %v548_v34  ;;  %v574_v46 = vmul.f32 %v548_v34, %v1099_v21  ;;  %v558_v5 = vmul.f32 %v557_v53, %v548_v34  ;;  %v1160_v36 = vmul.f32 %v1148_v26, %v1141_v37 }
  0x7e   :  { %v564_v48 = vmul.f32 %v563_v8, %v548_v34  ;;  %v1169_v50 = vmul.f32 %v541_v4, %v520_v59  ;;  %v1175_v6 = vmul.f32 %v569_v25, %v548_v34 }
  0x7f   :  { %v554_v54 = vadd.f32 %v552_v29, %v526_v33  ;;  %v1171_v0 = vsub.f32 %v574_v46, %v520_v59  ;;  %v560_v1 = vadd.f32 %v558_v5, %v532_v41  ;;  %v497_v62 = vmul.f32 %v495_v38, %v1160_v36 }
  0x80   :  { %v519_v63 = vmul.f32 %v1160_v36, %v1148_v26  ;;  %v503_v60 = vmul.f32 %v501_v51, %v1160_v36  ;;  %v566_v11 = vadd.f32 %v564_v48, %v538_v47  ;;  %v509_v24 = vmul.f32 %v507_v61, %v1160_v36 }
  0x81   :  { %v580_v59 = vmul.f32 %v579_v42, %v1171_v0  ;;  %v602_v12 = vmul.f32 %v1171_v0, %v1099_v21  ;;  %v586_v16 = vmul.f32 %v585_v55, %v1171_v0  ;;  %v592_v38 = vmul.f32 %v591_v9, %v1171_v0 }
  0x82   :  { %v499_v17 = vadd.f32 %v497_v62, %v271_v13  ;;  %v1197_v51 = vsub.f32 %v519_v63, %v1141_v37  ;;  %v505_v22 = vadd.f32 %v503_v60, %v275_v45  ;;  %v511_v45 = vadd.f32 %v509_v24, %v279_v49 }
  0x83   :  { %v582_v31 = vadd.f32 %v580_v59, %v554_v54  ;;  %v1202_v32 = vsub.f32 %v602_v12, %v548_v34  ;;  %v588_v33 = vadd.f32 %v586_v16, %v560_v1  ;;  %v594_v35 = vadd.f32 %v592_v38, %v566_v11 }
  0x84   :  { %v525_v41 = vmul.f32 %v523_v39, %v1197_v51  ;;  %v547_v13 = vmul.f32 %v1197_v51, %v1148_v26  ;;  %v531_v29 = vmul.f32 %v529_v52, %v1197_v51  ;;  %v537_v48 = vmul.f32 %v535_v3, %v1197_v51 }
  0x85   :  { %v608_v61 = vmul.f32 %v607_v10, %v1202_v32  ;;  %v630_v34 = vmul.f32 %v1202_v32, %v1099_v21  ;;  %v614_v46 = vmul.f32 %v613_v57, %v1202_v32  ;;  %v620_v39 = vmul.f32 %v619_v14, %v1202_v32 }
  0x86   :  { %v527_v5 = vadd.f32 %v525_v41, %v499_v17  ;;  %v1224_v52 = vsub.f32 %v547_v13, %v1160_v36  ;;  %v533_v47 = vadd.f32 %v531_v29, %v505_v22  ;;  %v539_v59 = vadd.f32 %v537_v48, %v511_v45 }
  0x87   :  { %v610_v49 = vadd.f32 %v608_v61, %v582_v31  ;;  %v632_v54 = vsub.f32 %v630_v34, %v1171_v0  ;;  %v616_v1 = vadd.f32 %v614_v46, %v588_v33  ;;  %v622_v62 = vadd.f32 %v620_v39, %v594_v35 }
  0x88   :  { %v553_v63 = vmul.f32 %v551_v40, %v1224_v52  ;;  %v575_v60 = vmul.f32 %v1224_v52, %v1148_v26  ;;  %v559_v11 = vmul.f32 %v557_v53, %v1224_v52  ;;  %v565_v53 = vmul.f32 %v563_v8, %v1224_v52 }
  0x89   :  { %v636_v3 = vmul.f32 %v635_v43, %v632_v54  ;;  %v658_v12 = vmul.f32 %v632_v54, %v1099_v21  ;;  %v642_v16 = vmul.f32 %v641_v58, %v632_v54  ;;  %v648_v38 = vmul.f32 %v647_v18, %v632_v54 }
  0x8a   :  { %v555_v40 = vadd.f32 %v553_v63, %v527_v5  ;;  %v1246_v17 = vsub.f32 %v575_v60, %v1197_v51  ;;  %v561_v22 = vadd.f32 %v559_v11, %v533_v47  ;;  %v567_v29 = vadd.f32 %v565_v53, %v539_v59 }
  0x8b   :  { %v638_v24 = vadd.f32 %v636_v3, %v610_v49  ;;  %v660_v31 = vsub.f32 %v658_v12, %v1202_v32  ;;  %v644_v21 = vadd.f32 %v642_v16, %v616_v1  ;;  %v650_v33 = vadd.f32 %v648_v38, %v622_v62 }
  0x8c   :  { %v581_v35 = vmul.f32 %v579_v42, %v1246_v17  ;;  %v603_v41 = vmul.f32 %v1246_v17, %v1148_v26  ;;  %v587_v13 = vmul.f32 %v585_v55, %v1246_v17  ;;  %v593_v34 = vmul.f32 %v591_v9, %v1246_v17 }
  0x8d   :  { %v664_v8 = vmul.f32 %v663_v44, %v660_v31  ;;  %v670_v45 = vmul.f32 %v669_v56, %v660_v31  ;;  %v676_v61 = vmul.f32 %v675_v19, %v660_v31  ;;  %v544_v5 = vadd.f32 %v1169_v50, %v1127_v7 }
  0x8e   :  { %v583_v42 = vadd.f32 %v581_v35, %v555_v40  ;;  %v605_v46 = vsub.f32 %v603_v41, %v1224_v52  ;;  %v589_v39 = vadd.f32 %v587_v13, %v561_v22  ;;  %v595_v49 = vadd.f32 %v593_v34, %v567_v29 }
  0x8f   :  { %v666_v55 = vadd.f32 %v664_v8, %v638_v24  ;;  %v672_v47 = vadd.f32 %v670_v45, %v644_v21  ;;  %v678_v48 = vadd.f32 %v676_v61, %v650_v33  ;;  %v626_v12 = vmul.f32 %v625_v30, %v1202_v32 }
  0x90   :  { %v609_v1 = vmul.f32 %v607_v10, %v605_v46  ;;  %v631_v62 = vmul.f32 %v605_v46, %v1148_v26  ;;  %v615_v9 = vmul.f32 %v613_v57, %v605_v46  ;;  %v621_v63 = vmul.f32 %v619_v14, %v605_v46 }
  0x91   :  { %v686_v60 = vmul.f32 %v1087_v15, %v666_v55  ;;  %v690_v7 = vmul.f32 %v1087_v15, %v672_v47  ;;  %v695_v50 = vmul.f32 %v1087_v15, %v678_v48  ;;  %v572_v10 = vadd.f32 %v1175_v6, %v544_v5 }
  0x92   :  { %v611_v11 = vadd.f32 %v609_v1, %v583_v42  ;;  %v633_v59 = vsub.f32 %v631_v62, %v1246_v17  ;;  %v617_v57 = vadd.f32 %v615_v9, %v589_v39  ;;  %v623_v3 = vadd.f32 %v621_v63, %v595_v49 }
  0x93   :  { %688 = vst [vmem:[#allocation9] sm:$0xff] %v686_v60  ;;  %693 = vst [vmem:[#allocation9 + $0x10] sm:$0xff] %v690_v7  ;;  %v598_v14 = vmul.f32 %v597_v27, %v1171_v0  ;;  %v654_v16 = vmul.f32 %v653_v2, %v632_v54  ;;  %v681_v6 = vstv %s1252_s1  ;;  %v283_v0 = vmul.f32 %v281_v28, %v1141_v37 }
  0x94   :  { %698 = vst [vmem:[#allocation9 + $0x20] sm:$0xff] %v695_v50  ;;  %v637_v38 = vmul.f32 %v635_v43, %v633_v59  ;;  %v659_v40 = vmul.f32 %v633_v59, %v1148_v26  ;;  %v643_v22 = vmul.f32 %v641_v58, %v633_v59  ;;  %v649_v53 = vmul.f32 %v647_v18, %v633_v59 }
  0x95   :  { %v600_v24 = vadd.f32 %v598_v14, %v572_v10  ;;  %v515_v32 = vmul.f32 %v513_v23, %v1160_v36  ;;  %v543_v43 = vmul.f32 %v541_v4, %v1197_v51  ;;  %v682_v35 = vmul.f32 %v681_v6, %v660_v31 }
  0x96   :  { %v639_v54 = vadd.f32 %v637_v38, %v611_v11  ;;  %v661_v21 = vsub.f32 %v659_v40, %v605_v46  ;;  %v645_v26 = vadd.f32 %v643_v22, %v617_v57  ;;  %v651_v33 = vadd.f32 %v649_v53, %v623_v3 }
  0x97   :  { %v628_v58 = vadd.f32 %v626_v12, %v600_v24  ;;  %v517_v41 = vadd.f32 %v515_v32, %v283_v0  ;;  %v571_v18 = vmul.f32 %v569_v25, %v1224_v52  ;;  %v599_v51 = vmul.f32 %v597_v27, %v1246_v17 }
  0x98   :  { %v665_v28 = vmul.f32 %v663_v44, %v661_v21  ;;  %v671_v37 = vmul.f32 %v669_v56, %v661_v21  ;;  %v677_v23 = vmul.f32 %v675_v19, %v661_v21  ;;  %v627_v61 = vmul.f32 %v625_v30, %v605_v46 }
  0x99   :  { %v656_v36 = vadd.f32 %v654_v16, %v628_v58  ;;  %v545_v4 = vadd.f32 %v543_v43, %v517_v41  ;;  %v655_v34 = vmul.f32 %v653_v2, %v633_v59  ;;  %v683_v17 = vmul.f32 %v681_v6, %v661_v21 }
  0x9a   :  { %v667_v13 = vadd.f32 %v665_v28, %v639_v54  ;;  %v673_v29 = vadd.f32 %v671_v37, %v645_v26  ;;  %v679_v8 = vadd.f32 %v677_v23, %v651_v33 }
  0x9b   :  { %v684_v31 = vadd.f32 %v682_v35, %v656_v36  ;;  %v573_v45 = vadd.f32 %v571_v18, %v545_v4 }
  0x9c   :  { %v687_v25 = vmul.f32 %v1091_v20, %v667_v13  ;;  %v691_v44 = vmul.f32 %v1091_v20, %v673_v29  ;;  %v696_v56 = vmul.f32 %v1091_v20, %v679_v8 }
  0x9d   :  { %v700_v19 = vmul.f32 %v1087_v15, %v684_v31  ;;  %v601_v52 = vadd.f32 %v599_v51, %v573_v45 }
  0x9e   :  { %689 = vst [vmem:[#allocation9 + $0x8] sm:$0xff] %v687_v25  ;;  %694 = vst [vmem:[#allocation9 + $0x18] sm:$0xff] %v691_v44 }
  0x9f   :  { %699 = vst [vmem:[#allocation9 + $0x28] sm:$0xff] %v696_v56  ;;  %703 = vst [vmem:[#allocation9 + $0x30] sm:$0xff] %v700_v19  ;;  %v629_v27 = vadd.f32 %v627_v61, %v601_v52 }
  0xa1   :  { %v657_v42 = vadd.f32 %v655_v34, %v629_v27 }
  0xa3   :  { %v685_v30 = vadd.f32 %v683_v17, %v657_v42 }
  0xa5   :  { %v701_v46 = vmul.f32 %v1091_v20, %v685_v30 }
  0xa7   :  { %704 = vst [vmem:[#allocation9 + $0x38] sm:$0xff] %v701_v46 }
  0xa8   :  { %850 = shalt.err (!%p847_p9)
}
  0xa9   :  { %s1349_s3 = smov 8   ;;  %s1350_s24 = smov 128  }
  0xaa   :  { %s1351_s27 = sld [smem:[#allocation14_spill]] }
  0xb0   :  { %716 = dma.vmem_to_hbm [thread:$0]  %s711_s22, 1024, %s1351_s27, [#allocation4], %s1350_s24, %s1350_s24, %s1349_s3  }
  0xb1   :  { %865 = dma.done.wait [#allocation4], 1024  }
  0xb2   :  { %866 = vsyncadd [#allocation4], 4294966272 }
  0xb3   :  { %720 = vsyncpa [#allocation3], 1 }
  0xb4   :  { %721 = vsyncpa [#allocation4], 1 }
  0xb5   :  { %722 = vsyncpa [#allocation5], 1 }
  0xb6   :  { %723 = vsyncpa [#allocation7], 1 }

</bundles_post_ra>
